<compile_context>
chip_gen: v5e
topology: v5e:2x2
jax: 0.10.0
libtpu: 0.0.40
codegen_flags: <defaults>
</compile_context>

<pallas_src>
import jax
import jax.numpy as jnp
from jax.experimental import pallas as pl
from jax.experimental.pallas import tpu as pltpu


def _round_up(x: int, m: int) -> int:
    return ((x + m - 1) // m) * m


def fmodule_kernel(x_ref, w1t_ref, b1_ref, wp_ref, o_ref):
    """One batch tile of:  pm = tanh(x @ W1^T + b1) @ (W2 @ pin)."""
    # Matmul 1 on the MXU in bf16 with f32 accumulation.  The f32->bf16 cast of x
    # happens in-kernel (VPU), so the wrapper never rewrites x in HBM.
    h = jnp.dot(
        x_ref[...].astype(w1t_ref.dtype), w1t_ref[...],
        preferred_element_type=jnp.float32,
    )
    # Bias-add + tanh stay in f32 (VPU/EUP; v5e has no bf16 elementwise path).
    f = jnp.tanh(h + b1_ref[...])
    # Matmul 2 against the pre-folded wp = W2 @ pin, kept in f32: P is tiny, the
    # extra MXU passes are negligible and it tightens accuracy vs. the f32 math.
    o_ref[...] = jnp.dot(
        f, wp_ref[...], preferred_element_type=jnp.float32
    ).astype(o_ref.dtype)


def fmodule_forward(xin, w1t, b1, w2, pin, *, tb=512, matmul_dtype=jnp.bfloat16):
    """xin:(B,L1in) w1t:(L1in,current) b1:(current,) w2:(current,L2out) pin:(L2out,P)."""
    B, L1in = xin.shape
    current = w1t.shape[1]
    L2out, P = pin.shape
    assert w1t.shape[0] == L1in and b1.shape == (current,) and w2.shape == (current, L2out)

    # Fold the last two matmuls:  (f @ W2) @ pin == f @ (W2 @ pin).
    # Done once here, in f32 (tiny (current,L2out)x(L2out,P) matmul).
    wp = jnp.dot(
        w2.astype(jnp.float32), pin.astype(jnp.float32),
        preferred_element_type=jnp.float32,
    )  # (current, P)

    w1_c = w1t.astype(matmul_dtype)                    # resident bf16 weight
    b1_c = b1.reshape(1, current).astype(jnp.float32)  # resident f32 bias (row)

    # Batch tiling.  Single tile (no padding, no grid loop) when B fits in tb;
    # otherwise an EVEN number of equal tiles so v7x's two TensorCores split the
    # "parallel" batch axis evenly.  TB must be a multiple of 8 only when the
    # block is not the full batch dim (sublane constraint).
    if B <= tb:
        TB, n_steps, Bp = B, 1, B
        x_in = xin
    else:
        n_steps = pl.cdiv(B, tb)
        n_steps += n_steps % 2                    # even step count (v7x megacore)
        TB = _round_up(pl.cdiv(B, n_steps), 8)
        Bp = n_steps * TB
        x_in = jnp.pad(xin, ((0, Bp - B), (0, 0))) if Bp != B else xin

    f32b, mmb = 4, jnp.dtype(matmul_dtype).itemsize

    cost = pl.CostEstimate(
        flops=2 * Bp * L1in * current + 2 * Bp * current * P,
        transcendentals=Bp * current,
        bytes_accessed=(Bp * L1in * f32b) + (L1in * current * mmb)
        + (current * f32b) + (current * P * f32b) + (Bp * P * f32b),
    )

    # Honest VMEM budget: Pallas double-buffers every spec (including the
    # constant-index resident operands), plus the f32 intermediate f, plus margin.
    tile_bytes = TB * L1in * f32b + TB * P * f32b
    resident_bytes = L1in * current * mmb + current * f32b + current * P * f32b
    kernel_vmem = 2 * (tile_bytes + resident_bytes) + TB * current * f32b
    try:
        vmem_cap = int(pltpu.get_tpu_info().vmem_capacity_bytes)
    except Exception:
        vmem_cap = 64 << 20  # v7x per-core size: safe lower bound everywhere
    vmem_limit = min(max(2 * kernel_vmem, 16 << 20), (vmem_cap * 3) // 4)

    out = pl.pallas_call(
        fmodule_kernel,
        out_shape=jax.ShapeDtypeStruct((Bp, P), jnp.float32),
        grid=(n_steps,),
        in_specs=[
            pl.BlockSpec((TB, L1in), lambda i: (i, 0)),       # batch-tiled f32 x
            pl.BlockSpec((L1in, current), lambda i: (0, 0)),  # resident W1^T (bf16)
            pl.BlockSpec((1, current), lambda i: (0, 0)),     # resident bias (f32)
            pl.BlockSpec((current, P), lambda i: (0, 0)),     # resident W2@pin (f32)
        ],
        out_specs=pl.BlockSpec((TB, P), lambda i: (i, 0)),
        compiler_params=pltpu.CompilerParams(
            dimension_semantics=("parallel",),  # v7x: shard batch tiles across 2 TCs
            vmem_limit_bytes=vmem_limit,
        ),
        cost_estimate=cost,
    )(x_in, w1_c, b1_c, wp)

    return out[:B]


def fmodule_reference_mixed(xin, w1t, b1, w2, pin, matmul_dtype=jnp.bfloat16):
    """Reference mirroring the kernel recipe (bf16 matmul-1, f32 elsewhere)."""
    h = jnp.dot(xin.astype(matmul_dtype), w1t.astype(matmul_dtype),
                preferred_element_type=jnp.float32)
    f = jnp.tanh(h + b1.reshape(1, -1).astype(jnp.float32))
    wp = jnp.dot(w2, pin, preferred_element_type=jnp.float32)
    return jnp.dot(f, wp, preferred_element_type=jnp.float32)


def fmodule_reference_f32(xin, w1t, b1, w2, pin):
    """Original module math, full f32, original association order."""
    hi = jax.lax.Precision.HIGHEST
    f = jnp.tanh(jnp.dot(xin, w1t, precision=hi) + b1.reshape(1, -1))
    return jnp.dot(jnp.dot(f, w2, precision=hi), pin, precision=hi)


if __name__ == "__main__":
    # Small shapes consistent with FModule(L1in, current, L2out).
    B, L1in, current, L2out, P = 48, 32, 64, 32, 16

    key = jax.random.PRNGKey(0)
    k_x, k_p, k_w1, k_b1, k_w2 = jax.random.split(key, 5)

    xin = jax.random.normal(k_x, (B, L1in), dtype=jnp.float32)
    pin = jax.random.normal(k_p, (L2out, P), dtype=jnp.float32)
    w1t = jax.random.normal(k_w1, (L1in, current), dtype=jnp.float32) * 0.1  # Linear W^T
    b1 = jax.random.normal(k_b1, (current,), dtype=jnp.float32) * 0.1        # Linear bias
    w2 = jax.random.normal(k_w2, (current, L2out), dtype=jnp.float32) * 0.1  # self.weight

    ref_mixed = fmodule_reference_mixed(xin, w1t, b1, w2, pin)
    ref_f32 = fmodule_reference_f32(xin, w1t, b1, w2, pin)

    # Path 1: whole batch in a single tile (grid=(1,), zero padding anywhere).
    out1 = jax.block_until_ready(fmodule_forward(xin, w1t, b1, w2, pin))
    assert out1.shape == (B, P)
    assert jnp.allclose(out1, ref_mixed, atol=5e-3, rtol=5e-3), "single-tile: mismatch vs mixed ref"
    assert jnp.allclose(out1, ref_f32, atol=4e-2, rtol=4e-2), "single-tile: mismatch vs f32 ref"

    # Path 2: multi-tile batch grid (even step count for v7x, batch-only padding).
    out2 = jax.block_until_ready(fmodule_forward(xin, w1t, b1, w2, pin, tb=16))
    assert out2.shape == (B, P)
    assert jnp.allclose(out2, ref_mixed, atol=5e-3, rtol=5e-3), "multi-tile: mismatch vs mixed ref"
    assert jnp.allclose(out2, ref_f32, atol=4e-2, rtol=4e-2), "multi-tile: mismatch vs f32 ref"

    print("KERNEL_OK")
</pallas_src>

<mosaic_0001>
module attributes {stable_mosaic.version = 11 : i64} {
  func.func @fmodule_kernel(%arg0: i32, %arg1: memref<48x32xf32, #tpu.memory_space<vmem>>, %arg2: memref<32x64xbf16, #tpu.memory_space<vmem>>, %arg3: memref<1x64xf32, #tpu.memory_space<vmem>>, %arg4: memref<64x16xf32, #tpu.memory_space<vmem>>, %arg5: memref<48x16xf32, #tpu.memory_space<vmem>>) attributes {dimension_semantics = [#tpu.dimension_semantics<parallel>], iteration_bounds = array<i64: 1>, scalar_prefetch = 0 : i64, scratch_operands = 0 : i64, tpu.core_type = #tpu.core_type<tc>, window_params = [{transform_indices = @transform_0, window_bounds = array<i64: 48, 32>}, {pipeline_mode = #tpu.pipeline_mode<synchronous>, transform_indices = @transform_1, window_bounds = array<i64: 32, 64>}, {pipeline_mode = #tpu.pipeline_mode<synchronous>, transform_indices = @transform_2, window_bounds = array<i64: 1, 64>}, {pipeline_mode = #tpu.pipeline_mode<synchronous>, transform_indices = @transform_3, window_bounds = array<i64: 64, 16>}, {transform_indices = @transform_4, window_bounds = array<i64: 48, 16>}]} {
    %c0 = arith.constant 0 : index
    %c0_0 = arith.constant 0 : index
    %0 = vector.load %arg1[%c0, %c0_0] : memref<48x32xf32, #tpu.memory_space<vmem>>, vector<48x32xf32>
    %1 = arith.truncf %0 : vector<48x32xf32> to vector<48x32xbf16>
    %c0_1 = arith.constant 0 : index
    %c0_2 = arith.constant 0 : index
    %2 = vector.load %arg2[%c0_1, %c0_2] : memref<32x64xbf16, #tpu.memory_space<vmem>>, vector<32x64xbf16>
    %cst = arith.constant dense<0.000000e+00> : vector<48x64xf32>
    %3 = tpu.matmul %1, %2, %cst {dimension_numbers = #tpu.dot_dimension_numbers<[1], [0], [0], [1], [0, 0, 1, 1], [], []>} : vector<48x32xbf16>, vector<32x64xbf16>, vector<48x64xf32> -> vector<48x64xf32>
    %c0_3 = arith.constant 0 : index
    %c0_4 = arith.constant 0 : index
    %4 = vector.load %arg3[%c0_3, %c0_4] : memref<1x64xf32, #tpu.memory_space<vmem>>, vector<1x64xf32>
    %5 = vector.broadcast %4 : vector<1x64xf32> to vector<48x64xf32>
    %6 = arith.addf %3, %5 : vector<48x64xf32>
    %7 = math.tanh %6 : vector<48x64xf32>
    %c0_5 = arith.constant 0 : index
    %c0_6 = arith.constant 0 : index
    %8 = vector.load %arg4[%c0_5, %c0_6] : memref<64x16xf32, #tpu.memory_space<vmem>>, vector<64x16xf32>
    %cst_7 = arith.constant dense<0.000000e+00> : vector<48x16xf32>
    %9 = tpu.matmul %7, %8, %cst_7 {dimension_numbers = #tpu.dot_dimension_numbers<[1], [0], [0], [1], [0, 0, 1, 1], [], []>} : vector<48x64xf32>, vector<64x16xf32>, vector<48x16xf32> -> vector<48x16xf32>
    %c0_8 = arith.constant 0 : index
    %c0_9 = arith.constant 0 : index
    %10 = vector.load %arg5[%c0_8, %c0_9] : memref<48x16xf32, #tpu.memory_space<vmem>>, vector<48x16xf32>
    tpu.vector_store %arg5[%c0_8, %c0_9], %9 {strides = array<i32>} : memref<48x16xf32, #tpu.memory_space<vmem>>, vector<48x16xf32>,
    return
  }
  func.func @transform_0(%arg0: i32) -> (i32, i32) {
    %c0_i32 = arith.constant 0 : i32
    %c0_i32_0 = arith.constant 0 : i32
    return %arg0, %c0_i32 : i32, i32
  }
  func.func @transform_1(%arg0: i32) -> (i32, i32) {
    %c0_i32 = arith.constant 0 : i32
    %c0_i32_0 = arith.constant 0 : i32
    %c0_i32_1 = arith.constant 0 : i32
    return %c0_i32, %c0_i32_0 : i32, i32
  }
  func.func @transform_2(%arg0: i32) -> (i32, i32) {
    %c0_i32 = arith.constant 0 : i32
    %c0_i32_0 = arith.constant 0 : i32
    %c0_i32_1 = arith.constant 0 : i32
    return %c0_i32, %c0_i32_0 : i32, i32
  }
  func.func @transform_3(%arg0: i32) -> (i32, i32) {
    %c0_i32 = arith.constant 0 : i32
    %c0_i32_0 = arith.constant 0 : i32
    %c0_i32_1 = arith.constant 0 : i32
    return %c0_i32, %c0_i32_0 : i32, i32
  }
  func.func @transform_4(%arg0: i32) -> (i32, i32) {
    %c0_i32 = arith.constant 0 : i32
    %c0_i32_0 = arith.constant 0 : i32
    return %arg0, %c0_i32 : i32, i32
  }
}

</mosaic_0001>

<bundles_post_ra>
// kernel: tpu_custom_call.1
= control target key start
LH: loop header
LB: loop body
LE: loop exit
PB: predicated region body
PF: predicated region fallthrough
CT: control target
= control target key end

     0   :  { %vm47_vm0 = vcmask 261120   ;;  %vm95_vm1 = vcmask 523264   ;;  %vm149_vm2 = vcmask 130048   ;;  %s302_s1 = inlined_call_operand.vmem [shape: bf16[32,64], index: 1, kind: input, shape index: {}]   ;;  %s303_s0 = inlined_call_operand.vmem [shape: f32[48,32], index: 0, kind: input, shape index: {}]   ;;  %s304_s3 = inlined_call_operand.vmem [shape: f32[64,16], index: 3, kind: input, shape index: {}]   ;;  %s305_s2 = inlined_call_operand.vmem [shape: f32[1,64], index: 2, kind: input, shape index: {}]   ;;  %s306_s4 = inlined_call_operand.vmem [shape: f32[48,16], index: 4, kind: output, shape index: {}]  }
   0x1   :  { %v178_v0 = vld [vmem:[%s302_s1 + $0x8] sm:$0xff]  ;;  %v177_v1 = vld [vmem:[%s302_s1] sm:$0xff]  ;;  %v20_v4 = vld [vmem:[%s303_s0 + $0x10] sm:$0xff] }
   0x2   :  { %v18_v2 = vld [vmem:[%s303_s0] sm:$0xff]  ;;  %v19_v3 = vld [vmem:[%s303_s0 + $0x8] sm:$0xff]  ;;  %63 = vmatpush.bf16.msra.mxu0 %v178_v0  ;;  %179 = vmatpush.bf16.msra.mxu3 %v178_v0  ;;  %v21_v5 = vld [vmem:[%s303_s0 + $0x18] sm:$0xff] }
   0x3   :  { %v94_v6 = vld [vmem:[%s304_s3 + $0x38] sm:$0xff]  ;;  %v93_v7 = vld [vmem:[%s304_s3 + $0x30] sm:$0xff]  ;;  %v92_v8 = vld [vmem:[%s304_s3 + $0x28] sm:$0xff]  ;;  %v24_v9 = vpack.c.bf16 %v19_v3, %v18_v2  ;;  %v25_v10 = vpack.c.bf16 %v21_v5, %v20_v4 }
   0x4   :  { %122 = vmatpush.msra.mxu1 %v94_v6  ;;  %181 = vmatpush.msra.mxu2 %v94_v6  ;;  %v22_v11 = vld [vmem:[%s303_s0 + $0x20] sm:$0xff]  ;;  %v23_v12 = vld [vmem:[%s303_s0 + $0x28] sm:$0xff]  ;;  %v90_v15 = vld [vmem:[%s304_s3 + $0x18] sm:$0xff] }
   0x5   :  { %v26_v13 = vpack.c.bf16 %v23_v12, %v22_v11  ;;  %v91_v14 = vld [vmem:[%s304_s3 + $0x20] sm:$0xff]  ;;  %v89_v16 = vld [vmem:[%s304_s3 + $0x10] sm:$0xff]  ;;  %v88_v17 = vld [vmem:[%s304_s3 + $0x8] sm:$0xff] }
   0x6   :  { %123 = vmatpush.msra.mxu1 %v93_v7  ;;  %182 = vmatpush.msra.mxu2 %v93_v7  ;;  %v87_v18 = vld [vmem:[%s304_s3] sm:$0xff] }
   0x7   :  { %64 = vmatpush.bf16.msra.mxu0 %v177_v1  ;;  %180 = vmatpush.bf16.msra.mxu3 %v177_v1  ;;  %v189_v19 = vld [vmem:[%s305_s2] ss:$0 sm:$0xff] }
   0x8   :  { %124 = vmatpush.msra.mxu1 %v92_v8  ;;  %183 = vmatpush.msra.mxu2 %v92_v8 }
   0xa   :  { %168 = vmatmul.msk.bf16.vlgmr.msra.gmra.mxu0 %vm47_vm0, %v24_v9  ;;  %169 = vmatmul.msk.bf16.vlgmr.msra.gmra.mxu3 %vm47_vm0, %v25_v10 }
   0xb   :  { %125 = vmatpush.msra.mxu1 %v91_v14  ;;  %184 = vmatpush.msra.mxu2 %v91_v14 }
   0xd   :  { %126 = vmatpush.msra.mxu1 %v90_v15  ;;  %185 = vmatpush.msra.mxu2 %v90_v15 }
   0xf   :  { %127 = vmatpush.msra.mxu1 %v89_v16  ;;  %186 = vmatpush.msra.mxu2 %v89_v16 }
  0x11   :  { %128 = vmatpush.msra.mxu1 %v88_v17  ;;  %187 = vmatpush.msra.mxu2 %v88_v17 }
  0x13   :  { %129 = vmatpush.msra.mxu1 %v87_v18  ;;  %188 = vmatpush.msra.mxu2 %v87_v18 }
  0x1a   :  { %170 = vmatmul.msk.bf16.gmra.mxu3 %vm47_vm0, %v26_v13 }
  0x87   :  { %v66_v20 = vpop.f32.mrf.mxu0 }
  0x88   :  { %v67_v21 = vadd.f32 %v189_v19, %v66_v20 }
  0x8a   :  { %190 = vtanh.f32 %v67_v21 }
  0x8d   :  { %v71_v22 = vpop.f32.mrf.mxu3 }
  0x8e   :  { %v72_v27 = vadd.f32 %v189_v19, %v71_v22 }
  0x8f   :  { %v68_v23 = vpop.f32.mrf.mxu0 }
  0x90   :  { %v191_v24 = vpop.eup %190  ;;  %v69_v25 = vadd.f32 %v189_v19, %v68_v23 }
  0x91   :  { %171 = vmatmul.msk.f32.vlgmr.msra.gmra.mxu1 %vm95_vm1, %v191_v24 }
  0x92   :  { %192 = vtanh.f32 %v69_v25 }
  0x95   :  { %v73_v26 = vpop.f32.mrf.mxu3 }
  0x96   :  { %v74_v28 = vadd.f32 %v189_v19, %v73_v26 }
  0x98   :  { %v193_v29 = vpop.eup %192  ;;  %194 = vtanh.f32 %v74_v28 }
  0x99   :  { %172 = vmatmul.msk.f32.gmra.mxu1 %vm95_vm1, %v193_v29  ;;  %196 = vtanh.f32 %v72_v27 }
  0x9d   :  { %v76_v30 = vpop.f32.mrf.mxu3 }
  0x9e   :  { %v195_v31 = vpop.eup %194  ;;  %v77_v32 = vadd.f32 %v189_v19, %v76_v30 }
  0x9f   :  { %174 = vmatmul.msk.f32.vlgmr.msra.gmra.mxu2 %vm95_vm1, %v195_v31  ;;  %v197_v33 = vpop.eup %196 }
  0xa0   :  { %198 = vtanh.f32 %v77_v32 }
  0xa1   :  { %173 = vmatmul.msk.f32.gmra.mxu1 %vm95_vm1, %v197_v33 }
  0xa5   :  { %v78_v34 = vpop.f32.mrf.mxu3 }
  0xa6   :  { %v199_v35 = vpop.eup %198  ;;  %v79_v36 = vadd.f32 %v189_v19, %v78_v34 }
  0xa7   :  { %175 = vmatmul.msk.f32.gmra.mxu2 %vm95_vm1, %v199_v35 }
  0xa8   :  { %200 = vtanh.f32 %v79_v36 }
  0xae   :  { %v201_v37 = vpop.eup %200 }
  0xaf   :  { %176 = vmatmul.msk.f32.gmra.mxu2 %vm95_vm1, %v201_v37 }
 0x10e   :  { %v131_v38 = vpop.f32.mrf.mxu1 }
 0x10f   :  { %150 = vst.msk [vmem:[%s306_s4] sm:$0xff] %vm149_vm2, %v131_v38 }
 0x116   :  { %v134_v39 = vpop.f32.mrf.mxu1 }
 0x117   :  { %151 = vst.msk [vmem:[%s306_s4 + $0x8] sm:$0xff] %vm149_vm2, %v134_v39 }
 0x11e   :  { %v137_v40 = vpop.f32.mrf.mxu1 }
 0x11f   :  { %152 = vst.msk [vmem:[%s306_s4 + $0x10] sm:$0xff] %vm149_vm2, %v137_v40 }
 0x122   :  { %v140_v41 = vpop.f32.mrf.mxu2 }
 0x123   :  { %153 = vst.msk [vmem:[%s306_s4 + $0x18] sm:$0xff] %vm149_vm2, %v140_v41 }
 0x12a   :  { %v143_v42 = vpop.f32.mrf.mxu2 }
 0x12b   :  { %154 = vst.msk [vmem:[%s306_s4 + $0x20] sm:$0xff] %vm149_vm2, %v143_v42 }
 0x132   :  { %v146_v43 = vpop.f32.mrf.mxu2 }
 0x133   :  { %155 = vst.msk [vmem:[%s306_s4 + $0x28] sm:$0xff] %vm149_vm2, %v146_v43 }

</bundles_post_ra>
